<compile_context>
chip_gen: v7x
topology: tpu7x:2x2x1
jax: 0.10.0
libtpu: 0.0.40
codegen_flags: <defaults>
</compile_context>

<pallas_src>
import functools

import jax
import jax.numpy as jnp
from jax import lax
from jax.experimental import pallas as pl
from jax.experimental.pallas import tpu as pltpu


def _embedding_gather_kernel(ids_ref, table_hbm, out_ref, copy_sem):
    # ids_ref:   (N_pad,) int32 in SMEM (scalar-prefetched token ids)
    # table_hbm: (V, D) float32 left in HBM (memory_space=pl.ANY)
    # out_ref:   (tile_n, D) float32 pipelined VMEM output block for this step
    # copy_sem:  DMA semaphore shared by all row copies of this step
    step = pl.program_id(0)
    tile_n = out_ref.shape[0]
    base = step * tile_n

    def issue(r, carry):
        tok = ids_ref[base + r]
        pltpu.make_async_copy(
            table_hbm.at[pl.ds(tok, 1), :],
            out_ref.at[pl.ds(r, 1), :],
            copy_sem,
        ).start()
        return carry

    def drain(r, carry):
        # All row copies are identically shaped, so a fixed descriptor
        # (size + semaphore is all .wait() needs) drains one copy per call.
        pltpu.make_async_copy(
            table_hbm.at[pl.ds(0, 1), :],
            out_ref.at[pl.ds(0, 1), :],
            copy_sem,
        ).wait()
        return carry

    lax.fori_loop(0, tile_n, issue, 0)   # launch all row DMAs for this tile
    lax.fori_loop(0, tile_n, drain, 0)   # then wait for all of them


def _round_up(a, b):
    return (a + b - 1) // b * b


@functools.partial(jax.jit, static_argnames=("tile_n",))
def glove_embedding_forward(x, table, *, tile_n=128):
    """x: (B, S) integer token ids; table: (V, D) float32. Returns (B, S, D)."""
    B, S = x.shape
    V, D = table.shape
    N = B * S

    # Tokens per grid step: multiple of 8 (sublane tiling), capped by the
    # (padded) token count so tiny inputs still compile.
    tile_n = max(8, min(tile_n, _round_up(N, 8)))
    tile_n = _round_up(tile_n, 8)
    n_pad = _round_up(N, tile_n)

    # Clamp ids so an out-of-range token cannot trigger an out-of-bounds DMA.
    # TODO(synk): PyTorch nn.Embedding raises on out-of-range ids instead of
    # clamping; that host-side error has no in-kernel equivalent.
    idx = jnp.clip(x.reshape(N).astype(jnp.int32), 0, V - 1)
    if n_pad != N:
        # Padded slots gather row 0; they are sliced off below.
        idx = jnp.pad(idx, (0, n_pad - N))

    out = pl.pallas_call(
        _embedding_gather_kernel,
        out_shape=jax.ShapeDtypeStruct((n_pad, D), table.dtype),
        grid_spec=pltpu.PrefetchScalarGridSpec(
            num_scalar_prefetch=1,                         # ids -> SMEM
            grid=(n_pad // tile_n,),
            in_specs=[pl.BlockSpec(memory_space=pl.ANY)],  # table stays in HBM
            out_specs=pl.BlockSpec((tile_n, D), lambda i, ids: (i, 0)),
            scratch_shapes=[pltpu.SemaphoreType.DMA(())],
        ),
        compiler_params=pltpu.CompilerParams(
            dimension_semantics=("parallel",),
        ),
    )(idx, table)

    return out[:N].reshape(B, S, D)


def make_embeddings_matrix_synthetic(key, vocab_size, embedding_dim):
    """Deterministic stand-in for make_embeddings_matrix(init_type='random'):
    random normal rows, L2-normalized (no pretrained vectors overwrite them)."""
    m = jax.random.normal(key, (vocab_size, embedding_dim), dtype=jnp.float32)
    norms = jnp.linalg.norm(m, ord=2, axis=1, keepdims=True)
    return m / jnp.maximum(norms, 1e-12)


if __name__ == "__main__":
    key = jax.random.PRNGKey(0)
    k_emb, k_idx = jax.random.split(key)

    # Small but representative shapes: vocab=1024, dim=128, 4x64 = 256 tokens
    # -> 2 grid steps of 128 tokens each.
    VOCAB = 1024
    DIM = 128
    B, S = 4, 64

    table = make_embeddings_matrix_synthetic(k_emb, VOCAB, DIM)
    x = jax.random.randint(k_idx, (B, S), 0, VOCAB, dtype=jnp.int32)

    out = glove_embedding_forward(x, table)
    out = jax.block_until_ready(out)

    # Reference check (plain JAX gather).
    ref = jnp.take(table, x.reshape(-1), axis=0).reshape(B, S, DIM)
    assert out.shape == (B, S, DIM)
    assert jnp.allclose(out, ref, atol=1e-6, rtol=1e-6)

    print("KERNEL_OK")
</pallas_src>

<mosaic_0001>
module attributes {stable_mosaic.version = 11 : i64} {
  func.func @_embedding_gather_kernel(%arg0: i32, %arg1: memref<256xi32, #tpu.memory_space<smem>>, %arg2: memref<1024x128xf32, #tpu.memory_space<any>>, %arg3: memref<128x128xf32, #tpu.memory_space<vmem>>, %arg4: memref<!tpu.dma_semaphore, #tpu.memory_space<semaphore_mem>>) attributes {dimension_semantics = [#tpu.dimension_semantics<parallel>], iteration_bounds = array<i64: 2>, scalar_prefetch = 1 : i64, scratch_operands = 1 : i64, tpu.core_type = #tpu.core_type<tc>, window_params = [{}, {transform_indices = @transform_1, window_bounds = array<i64: 128, 128>}]} {
    %c128_i32 = arith.constant 128 : i32
    %0 = arith.muli %arg0, %c128_i32 : i32
    %c0_i32 = arith.constant 0 : i32
    %c128_i32_0 = arith.constant 128 : i32
    %1 = arith.addi %c0_i32, %c128_i32_0 : i32
    %c1_i32 = arith.constant 1 : i32
    scf.for %arg5 = %c0_i32 to %1 step %c1_i32  : i32 {
      %3 = arith.addi %0, %arg5 : i32
      %4 = arith.index_cast %3 : i32 to index
      %5 = memref.load %arg1[%4] : memref<256xi32, #tpu.memory_space<smem>>
      %c0_i32_5 = arith.constant 0 : i32
      %6 = tpu.memref_slice %arg2[%5, %c0_i32_5] : memref<1024x128xf32, #tpu.memory_space<any>> -> memref<1x128xf32, #tpu.memory_space<any>>
      %c0_i32_6 = arith.constant 0 : i32
      %7 = tpu.memref_slice %arg3[%arg5, %c0_i32_6] : memref<128x128xf32, #tpu.memory_space<vmem>> -> memref<1x128xf32, #tpu.memory_space<vmem>>
      tpu.enqueue_dma source(%6 : memref<1x128xf32, #tpu.memory_space<any>>) target(%7 : memref<1x128xf32, #tpu.memory_space<vmem>>) target_semaphore(%arg4 : memref<!tpu.dma_semaphore, #tpu.memory_space<semaphore_mem>>)
    }
    %c128_i32_1 = arith.constant 128 : i32
    %c0_i32_2 = arith.constant 0 : i32
    %c128_i32_3 = arith.constant 128 : i32
    %2 = arith.addi %c0_i32_2, %c128_i32_3 : i32
    %c1_i32_4 = arith.constant 1 : i32
    scf.for %arg5 = %c0_i32_2 to %2 step %c1_i32_4  : i32 {
      %c0_i32_5 = arith.constant 0 : i32
      %c0_i32_6 = arith.constant 0 : i32
      %3 = tpu.memref_slice %arg2[%c0_i32_5, %c0_i32_6] : memref<1024x128xf32, #tpu.memory_space<any>> -> memref<1x128xf32, #tpu.memory_space<any>>
      %c0_i32_7 = arith.constant 0 : i32
      %c0_i32_8 = arith.constant 0 : i32
      %4 = tpu.memref_slice %arg3[%c0_i32_7, %c0_i32_8] : memref<128x128xf32, #tpu.memory_space<vmem>> -> memref<1x128xf32, #tpu.memory_space<vmem>>
      tpu.wait_dma2 semaphore(%arg4 : memref<!tpu.dma_semaphore, #tpu.memory_space<semaphore_mem>>) src(%3 : memref<1x128xf32, #tpu.memory_space<any>>) dst(%4 : memref<1x128xf32, #tpu.memory_space<vmem>>)
    }
    return
  }
  func.func @transform_1(%arg0: i32, %arg1: memref<256xi32, #tpu.memory_space<smem>>) -> (i32, i32) {
    %c0_i32 = arith.constant 0 : i32
    %c0_i32_0 = arith.constant 0 : i32
    return %arg0, %c0_i32 : i32, i32
  }
}

</mosaic_0001>

<bundles_post_ra>
// kernel: glove_embedding_forward.1
= control target key start
LH: loop header
LB: loop body
LE: loop exit
PB: predicated region body
PF: predicated region fallthrough
CT: control target
= control target key end

     0   :  { %s486_s0 = inlined_call_operand.vmem [shape: s32[256], index: 0, kind: input, shape index: {}]   ;;  %s487_s1 = inlined_call_operand.hbm [shape: f32[1024,128], index: 1, kind: input, shape index: {}]   ;;  %s488_s2 = inlined_call_operand.hbm [shape: f32[256,128], index: 2, kind: output, shape index: {}]  }
   0x1   :  { %s7_s11 = sshll.u32 %s486_s0, 4  ;;  %s8_s11 = int_to_ptr.vmem [resolvable:$true] %s7_s11 }
   0x2   :  { %s229_s12 = scalar_lea.vmem %s8_s11, 32  ;;  %p234_p1 = scmp.lt.s32.totalorder %s8_s11, %s8_s11 }
   0x3   :  { %p230_p0 = scmp.ne.s32.totalorder %s8_s11, %s229_s12  ;;  %p235_p2 = scmp.lt.s32.totalorder %s229_s12, %s229_s12 }
   0x5   :  { %p236_p3 = por %p235_p2, %p234_p1 }
   0x7   :  { %p237_p4 = pnand %p236_p3, %p230_p0 }
   0x9   :  { %240 = shalt.err (!%p237_p4)  }
   0xa   :  { %s341_s13 = smov [#allocation4]  }
   0xb   :  { %10 = dma.vmem_to_smem %s8_s11, 32, %s341_s13, [#allocation3] }
   0xc   :  { %313 = dma.done.wait [#allocation3], 32 }
   0xd   :  { %314 = vsyncadd [#allocation3], 4294967264 }
   0xe   :  { %12 = sfence }
   0xf   :  { %13 = vsyncpa [#allocation6], 0 }
  0x10   :  { %15 = vsyncpa [#allocation6 + $0x1], 0  ;;  %s363_s14 = smov 0   ;;  %s365_s15 = smov 0  }
  0x11   :  { %s367_s0 = smov 0  }
  0x12 LB: > { %s166_s16 = sadd.s32 4294967295, %s331_s0   ;;  %s380_s17 = sadd.s32 1, %s331_s0   ;;  %s331_s0 = sphi %s367_s0, %s493_s0   ;;  %s327_s15 = sphi %s365_s15, %s492_s15   ;;  %s323_s14 = sphi %s363_s14, %s491_s14  }
  0x13   : > { %s24_s18 = ssub.s32 %s331_s0, %s380_s17  ;;  %s27_s19 = sadd.s32 1, %s327_s15 }
  0x14   : > { %p25_p5 = scmp.eq.s32.totalorder %s24_s18, 0  ;;  %p167_p6 = scmp.ne.s32.totalorder %s24_s18, 0 }
  0x15   : > { %p31_p7 = scmp.eq.s32.totalorder %s331_s0, 1  ;;  %p36_p8 = scmp.ne.s32.totalorder %s327_s15, %s323_s14 }
  0x16   : > { %s389_s20 = scalar_select %p25_p5, %s327_s15, %s27_s19  }
  0x17   : > { %p391_p9 = por %p167_p6, %p31_p7  ;;  %p37_p10 = scmp.eq.s32.totalorder %s166_s16, 1 }
  0x18   : > { %p168_p12 = scmp.ge.s32.totalorder %s331_s0, 2 }
  0x19   : > { %p395_p11 = por %p37_p10, %p36_p8  ;;  %s51_s23 = sand.u32 (!%p168_p12), 1, %s327_s15  }
  0x1a   : > { %46 = sbr.rel (%p168_p12) target bundleno = 101 (0x65), region = 12  ;;  %s170_s24 = sshll.u32 (!%p168_p12), %s331_s0, 7 }
  0x1b   : > { %s404_s25 = sshll.u32 (!%p168_p12), %s51_s23, 7  ;;  %s407_s27 = smov (!%p168_p12), 0  }
  0x1c   : > { %s53_s26 = scalar_lea.vmem (!%p168_p12), [#allocation5], %s404_s25 }
  0x21 LB: >> { %s62_s28 = sadd.s32 %s335_s27, %s170_s24  ;;  %s66_s29 = scalar_lea.vmem %s53_s26, %s335_s27 [#allocation5]  ;;  %s335_s27 = sphi %s407_s27, %s61_s27  }
  0x22   : >> { %s63_s30 = sld [smem:[#allocation4 + %s62_s28]]  ;;  %s74_s3 = sshll.u32 %s66_s29, 4  ;;  %s75_s3 = int_to_ptr.vmem [resolvable:$true] %s74_s3 }
  0x23   : >> { %s243_s11 = scalar_lea.hbm %s487_s1, 16384 }
  0x28   : >> { %s171_s4 = sshll.u32 %s63_s30, 4 }
  0x29   : >> { %s65_s7 = scalar_lea.hbm %s487_s1, %s171_s4 }
  0x2a   : >> { %s241_s8 = scalar_lea.hbm %s65_s7, 16  ;;  %p244_p0 = scmp.lt.u32.totalorder %s65_s7, %s487_s1 }
  0x2b   : >> { %p242_p13 = scmp.ne.s32.totalorder %s65_s7, %s241_s8  ;;  %p245_p1 = scmp.lt.u32.totalorder %s243_s11, %s241_s8 }
  0x2c   : >> { %p247_p3 = scmp.lt.u32.totalorder %s241_s8, %s65_s7 }
  0x2d   : >> { %p246_p2 = por %p245_p1, %p244_p0 }
  0x2f   : >> { %p248_p4 = por %p247_p3, %p246_p2 }
  0x31   : >> { %p249_p5 = pnand %p248_p4, %p242_p13 }
  0x33   : >> { %252 = shalt.err (!%p249_p5)  }
  0x34   : >> { %s253_s16 = scalar_lea.vmem %s75_s3, 16  ;;  %s342_s18 = smov [#allocation5]  }
  0x35   : >> { %p254_p6 = scmp.ne.s32.totalorder %s75_s3, %s253_s16  ;;  %s255_s19 = sshll.u32 %s342_s18, 4  ;;  %s427_s19 = int_to_ptr.vmem [resolvable:$false] %s255_s19 }
  0x36   : >> { %s257_s28 = scalar_lea.vmem %s427_s19, 4096  ;;  %p258_p7 = scmp.lt.s32.totalorder %s75_s3, %s427_s19 }
  0x37   : >> { %p259_p8 = scmp.lt.s32.totalorder %s257_s28, %s253_s16 }
  0x39   : >> { %p260_p10 = por %p259_p8, %p258_p7 }
  0x3b   : >> { %p261_p12 = pnand %p260_p10, %p254_p6 }
  0x3d   : >> { %264 = shalt.err (!%p261_p12)  }
  0x3e   : >> { %77 = dma.hbm_to_vmem [thread:$0]  %s65_s7, 16, %s75_s3, [#allocation2] }
  0x3f   : >> { %s61_s27 = sadd.s32 1, %s335_s27  }
  0x40   : >> { %p58_p13 = scmp.ge.s32.totalorder %s61_s27, 128  }
  0x41   : > { %s337_s29 = smov (%p58_p13), 0  }
  0x42   : > { %60 = sbr.rel (!%p58_p13) target bundleno = 33 (0x21), region = 64 }
  0x49 LB: >> { %315 = dma.done.wait [#allocation2], 16  ;;  %s339_s29 = sphi %s337_s29, %s83_s29  }
  0x4a   : >> { %316 = vsyncadd [#allocation2], 4294967280  ;;  %s83_s29 = sadd.s32 1, %s339_s29  }
  0x4b   : >> { %p80_p0 = scmp.ge.s32.totalorder %s83_s29, 128  }
  0x4c   : > { %s178_s30 = sshll.u32 (%p80_p0), %s331_s0, 11  ;;  %s101_s4 = sshll.u32 (%p80_p0), %s53_s26, 4  ;;  %s444_s4 = int_to_ptr.vmem [resolvable:$true] %s101_s4 }
  0x4d   : > { %82 = sbr.rel (!%p80_p0) target bundleno = 73 (0x49), region = 75  ;;  %s440_s24 = scalar_lea.hbm (%p80_p0), %s488_s2, %s178_s30 }
  0x4e   : > { %s88_s5 = scalar_lea.sflag (%p80_p0), [#allocation6], %s51_s23  ;;  %s265_s6 = scalar_lea.vmem (%p80_p0), %s444_s4, 2048 }
  0x4f   : > { %p266_p1 = scmp.ne.s32.totalorder (%p80_p0), %s444_s4, %s265_s6  ;;  %p272_p4 = scmp.lt.s32.totalorder (%p80_p0), %s444_s4, %s427_s19 }
  0x50   : > { %p273_p5 = scmp.lt.s32.totalorder (%p80_p0), %s257_s28, %s265_s6 }
  0x51   : > { %p267_p2 = pnand (%p80_p0), %p266_p1, %p391_p9 }
  0x52   : > { %p274_p6 = por (%p80_p0), %p273_p5, %p272_p4 }
  0x53   : > { %p268_p3 = pneg (%p80_p0), %p267_p2 }
  0x55   : > { %p275_p7 = pnand %p274_p6, %p268_p3 }
  0x57   : > { %278 = shalt.err (!%p275_p7)
}
  0x58   : > { %s279_s25 = scalar_lea.hbm %s440_s24, 2048  ;;  %s283_s7 = scalar_lea.hbm %s488_s2, 4096 }
  0x59   : > { %p280_p8 = scmp.ne.s32.totalorder %s440_s24, %s279_s25  ;;  %p284_p13 = scmp.lt.u32.totalorder %s440_s24, %s488_s2 }
  0x5a   : > { %p285_p0 = scmp.lt.u32.totalorder %s283_s7, %s279_s25  ;;  %p287_p2 = scmp.lt.u32.totalorder %s279_s25, %s440_s24 }
  0x5b   : > { %p281_p10 = pnand %p280_p8, %p391_p9 }
  0x5c   : > { %p286_p1 = por %p285_p0, %p284_p13 }
  0x5d   : > { %p282_p12 = pneg %p281_p10 }
  0x5e   : > { %p288_p3 = por %p287_p2, %p286_p1 }
  0x60   : > { %p289_p4 = pnand %p288_p3, %p282_p12 }
  0x62   : > { %292 = shalt.err (!%p289_p4)
}
  0x63   : > { %s343_s10 = smov 128   ;;  %s344_s11 = smov 8  }
  0x64   : > { %179 = dma.vmem_to_hbm [thread:$0]  (%p391_p9), %s444_s4, 2048, %s440_s24, %s88_s5, %s343_s10, %s343_s10, %s344_s11  }
  0x65 PF: > { %p185_p5 = scmp.ge.s32.totalorder %s331_s0, 1  ;;  %s116_s12 = sand.u32 1, %s323_s14  }
  0x66   : > { %s117_s13 = scalar_lea.sflag [#allocation6], %s116_s12 }
  0x67   : > { %p182_p6 = pnand %p185_p5, %p395_p11 }
  0x69   : > { %318 = dma.done.wait (!%p182_p6), %s117_s13, 2048  }
  0x6a   : > { %320 = vsyncadd (!%p182_p6), %s117_s13, 4294965248  ;;  %p18_p7 = scmp.ge.s32.totalorder %s380_s17, 3   ;;  %s491_s14 = smov %s327_s15 }
  0x6b   : > { %s492_s15 = smov %s389_s20  ;;  %s493_s0 = smov %s380_s17 }
  0x6c   :  { %20 = sbr.rel (!%p18_p7) target bundleno = 18 (0x12), region = 86 }
  0x73   :  { %122 = vsyncpa [#allocation6], 1 }
  0x74   :  { %124 = vsyncpa [#allocation6 + $0x1], 1 }
  0x75   :  { %125 = vsyncmov [#allocation2] }
  0x78   :  { %s126_s0 = vpop.sfrf %125 }
  0x79   :  { %p177_p9 = scmp.ne.s32.totalorder %s126_s0, 0 }
  0x7b   :  { %130 = shalt.err (%p177_p9)  }

</bundles_post_ra>
